<compile_context>
chip_gen: v7x
topology: tpu7x:2x2x1
jax: 0.10.0
libtpu: 0.0.40
codegen_flags: <defaults>
</compile_context>

<pallas_src>
import functools

import jax
import jax.numpy as jnp
import numpy as np
from jax.experimental import pallas as pl
from jax.experimental.pallas import tpu as pltpu

# ----------------------------- model config ---------------------------------
NUM_CHANNELS = 4        # C
NUM_RAW = 2             # num_mri_raw
NUM_MAPS = NUM_CHANNELS - NUM_RAW
CONTEXT_SIZE = 8
H1, H2 = 64, 32
BN_EPS = 1e-5
_HP = jax.lax.Precision.HIGHEST
_LANE = 128
_MAX_S_TILE = 512       # target lane-tile size (multiple of 128)


# ------------------------------- kernel -------------------------------------
def _ctx_kernel(a1_ref, a2_ref,                   # PReLU slopes (SMEM scalars)
                x_ref,                            # (C, S_TILE) native layout
                w1t_ref, b1_ref,                  # (H1, R), (H1, 1)
                w2t_ref, b2_ref,                  # (H2, H1), (H2, 1)
                w3t_ref, b3_ref,                  # (CTX, H2), (CTX, 1)  (BN folded)
                ctx_ref):                         # (CTX, S_TILE)
    a1 = a1_ref[0, 0]
    a2 = a2_ref[0, 0]
    x = x_ref[...]                                # (C, S_TILE)

    # Layer 1: K = NUM_RAW (=2) -> two lane-wide VPU broadcast-FMAs, skip MXU.
    h = b1_ref[...]                               # (H1,1) -> broadcasts to (H1,S_TILE)
    for r in range(NUM_RAW):
        h = h + w1t_ref[:, r:r + 1] * x[r:r + 1, :]
    h = jnp.where(h >= 0.0, h, a1 * h)            # PReLU
    # Dropout: identity in eval mode.

    # Layer 2 (64 -> 32) on the MXU, lane-dense.
    h = jnp.dot(w2t_ref[...], h,
                preferred_element_type=jnp.float32, precision=_HP) + b2_ref[...]
    h = jnp.where(h >= 0.0, h, a2 * h)            # PReLU
    # BatchNorm1d (eval) folded into layer 3; Dropout: identity in eval mode.

    # Layer 3 (32 -> context_size), BN scale/shift pre-folded into w3t/b3.
    ctx_ref[...] = jnp.dot(w3t_ref[...], h,
                           preferred_element_type=jnp.float32,
                           precision=_HP) + b3_ref[...]


# ------------------------------ wrapper --------------------------------------
def init_params(key):
    ks = jax.random.split(key, 6)
    p = {
        "w1": jax.random.normal(ks[0], (NUM_RAW, H1), jnp.float32) * 0.1,
        "b1": jax.random.normal(ks[1], (1, H1), jnp.float32) * 0.1,
        "w2": jax.random.normal(ks[2], (H1, H2), jnp.float32) * 0.1,
        "b2": jax.random.normal(ks[3], (1, H2), jnp.float32) * 0.1,
        "w3": jax.random.normal(ks[4], (H2, CONTEXT_SIZE), jnp.float32) * 0.1,
        "b3": jax.random.normal(ks[5], (1, CONTEXT_SIZE), jnp.float32) * 0.1,
        # PReLU default init (num_parameters=1, a=0.25)
        "a1": jnp.full((1, 1), 0.25, jnp.float32),
        "a2": jnp.full((1, 1), 0.25, jnp.float32),
        # BatchNorm1d fresh-module state (eval): gamma=1, beta=0, mean=0, var=1
        "bn_gamma": jnp.ones((1, H2), jnp.float32),
        "bn_beta": jnp.zeros((1, H2), jnp.float32),
        "bn_mean": jnp.zeros((1, H2), jnp.float32),
        "bn_var": jnp.ones((1, H2), jnp.float32),
    }
    return p


def _pick_s_tile(S):
    """Pad S to a lane multiple and pick the largest 128-multiple tile that divides it."""
    s_pad = ((S + _LANE - 1) // _LANE) * _LANE
    for t in (_MAX_S_TILE, 384, 256, _LANE):
        if t <= s_pad and s_pad % t == 0:
            return t, s_pad
    return _LANE, s_pad


@functools.partial(jax.jit, static_argnames=())
def context_mlp_forward(x, params):
    B, C, S = x.shape
    R, M = NUM_RAW, C - NUM_RAW
    out_f = CONTEXT_SIZE + M

    s_tile, s_pad = _pick_s_tile(S)
    x_in = x if s_pad == S else jnp.pad(x, ((0, 0), (0, 0), (0, s_pad - S)))

    # Fold BatchNorm (eval) into the last Linear; pre-transpose all weights so
    # the kernel computes features-on-sublanes, S-on-lanes.
    bn_scale = params["bn_gamma"] / jnp.sqrt(params["bn_var"] + BN_EPS)   # (1, H2)
    bn_shift = params["bn_beta"] - params["bn_mean"] * bn_scale           # (1, H2)
    w1t = params["w1"].T                                                  # (H1, R)
    b1c = params["b1"].reshape(H1, 1)
    w2t = params["w2"].T                                                  # (H2, H1)
    b2c = params["b2"].reshape(H2, 1)
    w3_f = params["w3"] * bn_scale.reshape(H2, 1)                         # (H2, CTX)
    b3_f = params["b3"] + jnp.dot(bn_shift, params["w3"], precision=_HP)  # (1, CTX)
    w3t = w3_f.T                                                          # (CTX, H2)
    b3c = b3_f.reshape(CONTEXT_SIZE, 1)

    grid = (B, s_pad // s_tile)
    smem_scalar = pl.BlockSpec((1, 1), lambda b, s: (0, 0),
                               memory_space=pltpu.MemorySpace.SMEM)

    def resident(shape):
        # Tiny weights/biases: constant index map -> resident across the grid.
        return pl.BlockSpec(shape, lambda b, s: (0,) * len(shape))

    ctx = pl.pallas_call(
        _ctx_kernel,
        out_shape=jax.ShapeDtypeStruct((B, CONTEXT_SIZE, s_pad), jnp.float32),
        grid=grid,
        in_specs=[
            smem_scalar,                                        # a1
            smem_scalar,                                        # a2
            pl.BlockSpec((None, C, s_tile), lambda b, s: (b, 0, s)),   # x (native NCW)
            resident((H1, R)), resident((H1, 1)),               # w1^T, b1
            resident((H2, H1)), resident((H2, 1)),              # w2^T, b2
            resident((CONTEXT_SIZE, H2)), resident((CONTEXT_SIZE, 1)),  # w3^T, b3 (BN folded)
        ],
        out_specs=pl.BlockSpec((None, CONTEXT_SIZE, s_tile), lambda b, s: (b, 0, s)),
        compiler_params=pltpu.CompilerParams(
            dimension_semantics=("parallel", "parallel")),
    )(params["a1"], params["a2"], x_in,
      w1t, b1c, w2t, b2c, w3t, b3c)

    # Assemble the interleaved [ctx_ii, maps_ii] layout outside the kernel
    # (maps never round-trip through the kernel; this is layout plumbing only).
    ctx = ctx[:, :, :S]                                   # (B, CTX, S)
    maps = x[:, R:, :]                                    # (B, M, S)
    combined = jnp.concatenate([ctx, maps], axis=1)       # (B, CTX+M, S)
    return jnp.transpose(combined, (0, 2, 1)).reshape(B, S * out_f)


# --------------------------- pure-JAX reference ------------------------------
def reference_forward(x, params):
    B, C, S = x.shape
    R = NUM_RAW
    bn_scale = params["bn_gamma"] / jnp.sqrt(params["bn_var"] + BN_EPS)
    bn_shift = params["bn_beta"] - params["bn_mean"] * bn_scale
    a1 = params["a1"][0, 0]
    a2 = params["a2"][0, 0]
    outs = []
    for ii in range(S):
        raw = x[:, :R, ii]
        maps = x[:, R:, ii]
        h = jnp.dot(raw, params["w1"], precision=_HP) + params["b1"]
        h = jnp.where(h >= 0, h, a1 * h)
        h = jnp.dot(h, params["w2"], precision=_HP) + params["b2"]
        h = jnp.where(h >= 0, h, a2 * h)
        h = h * bn_scale + bn_shift
        ctx = jnp.dot(h, params["w3"], precision=_HP) + params["b3"]
        outs.append(jnp.concatenate([ctx, maps], axis=1))
    return jnp.concatenate(outs, axis=1)


# --------------------------------- main --------------------------------------
if __name__ == "__main__":
    key = jax.random.PRNGKey(0)
    k_x, k_p = jax.random.split(key)

    B, S = 2, 16
    x = jax.random.normal(k_x, (B, NUM_CHANNELS, S), jnp.float32)
    params = init_params(k_p)

    out = context_mlp_forward(x, params)
    out = jax.block_until_ready(out)

    ref = reference_forward(x, params)
    assert out.shape == (B, S * (CONTEXT_SIZE + NUM_MAPS)), out.shape
    np.testing.assert_allclose(np.asarray(out), np.asarray(ref),
                               rtol=1e-4, atol=1e-5)
    print("KERNEL_OK")
</pallas_src>

<mosaic_0001>
module attributes {stable_mosaic.version = 11 : i64} {
  func.func @_ctx_kernel(%arg0: i32, %arg1: i32, %arg2: memref<1x1xf32, #tpu.memory_space<smem>>, %arg3: memref<1x1xf32, #tpu.memory_space<smem>>, %arg4: memref<1x4x128xf32, #tpu.memory_space<vmem>>, %arg5: memref<64x2xf32, #tpu.memory_space<vmem>>, %arg6: memref<64x1xf32, #tpu.memory_space<vmem>>, %arg7: memref<32x64xf32, #tpu.memory_space<vmem>>, %arg8: memref<32x1xf32, #tpu.memory_space<vmem>>, %arg9: memref<8x32xf32, #tpu.memory_space<vmem>>, %arg10: memref<8x1xf32, #tpu.memory_space<vmem>>, %arg11: memref<1x8x128xf32, #tpu.memory_space<vmem>>) attributes {dimension_semantics = [#tpu.dimension_semantics<parallel>, #tpu.dimension_semantics<parallel>], iteration_bounds = array<i64: 2, 1>, scalar_prefetch = 0 : i64, scratch_operands = 0 : i64, tpu.core_type = #tpu.core_type<tc>, window_params = [{transform_indices = @transform_0, window_bounds = array<i64: 1, 1>}, {transform_indices = @transform_1, window_bounds = array<i64: 1, 1>}, {transform_indices = @transform_2, window_bounds = array<i64: 1, 4, 128>}, {pipeline_mode = #tpu.pipeline_mode<synchronous>, transform_indices = @transform_3, window_bounds = array<i64: 64, 2>}, {pipeline_mode = #tpu.pipeline_mode<synchronous>, transform_indices = @transform_4, window_bounds = array<i64: 64, 1>}, {pipeline_mode = #tpu.pipeline_mode<synchronous>, transform_indices = @transform_5, window_bounds = array<i64: 32, 64>}, {pipeline_mode = #tpu.pipeline_mode<synchronous>, transform_indices = @transform_6, window_bounds = array<i64: 32, 1>}, {pipeline_mode = #tpu.pipeline_mode<synchronous>, transform_indices = @transform_7, window_bounds = array<i64: 8, 32>}, {pipeline_mode = #tpu.pipeline_mode<synchronous>, transform_indices = @transform_8, window_bounds = array<i64: 8, 1>}, {transform_indices = @transform_9, window_bounds = array<i64: 1, 8, 128>}]} {
    %c0 = arith.constant 0 : index
    %c0_0 = arith.constant 0 : index
    %0 = memref.load %arg2[%c0, %c0_0] : memref<1x1xf32, #tpu.memory_space<smem>>
    %c0_1 = arith.constant 0 : index
    %c0_2 = arith.constant 0 : index
    %1 = memref.load %arg3[%c0_1, %c0_2] : memref<1x1xf32, #tpu.memory_space<smem>>
    %c0_3 = arith.constant 0 : index
    %c0_4 = arith.constant 0 : index
    %c0_5 = arith.constant 0 : index
    %2 = vector.load %arg4[%c0_3, %c0_4, %c0_5] : memref<1x4x128xf32, #tpu.memory_space<vmem>>, vector<1x4x128xf32>
    %3 = vector.shape_cast %2 : vector<1x4x128xf32> to vector<4x128xf32>
    %c0_6 = arith.constant 0 : index
    %c0_7 = arith.constant 0 : index
    %4 = vector.load %arg6[%c0_6, %c0_7] : memref<64x1xf32, #tpu.memory_space<vmem>>, vector<64x1xf32>
    %c0_8 = arith.constant 0 : index
    %c0_9 = arith.constant 0 : index
    %5 = vector.load %arg5[%c0_8, %c0_9] : memref<64x2xf32, #tpu.memory_space<vmem>>, vector<64x1xf32>
    %6 = vector.extract_strided_slice %3 {offsets = [0, 0], sizes = [1, 128], strides = [1, 1]} : vector<4x128xf32> to vector<1x128xf32>
    %7 = vector.broadcast %5 : vector<64x1xf32> to vector<64x128xf32>
    %8 = vector.broadcast %6 : vector<1x128xf32> to vector<64x128xf32>
    %9 = arith.mulf %7, %8 : vector<64x128xf32>
    %10 = vector.broadcast %4 : vector<64x1xf32> to vector<64x128xf32>
    %11 = arith.addf %10, %9 : vector<64x128xf32>
    %c0_10 = arith.constant 0 : index
    %c1 = arith.constant 1 : index
    %12 = vector.load %arg5[%c0_10, %c1] : memref<64x2xf32, #tpu.memory_space<vmem>>, vector<64x1xf32>
    %13 = vector.extract_strided_slice %3 {offsets = [1, 0], sizes = [1, 128], strides = [1, 1]} : vector<4x128xf32> to vector<1x128xf32>
    %14 = vector.broadcast %12 : vector<64x1xf32> to vector<64x128xf32>
    %15 = vector.broadcast %13 : vector<1x128xf32> to vector<64x128xf32>
    %16 = arith.mulf %14, %15 : vector<64x128xf32>
    %17 = arith.addf %11, %16 : vector<64x128xf32>
    %cst = arith.constant 0.000000e+00 : f32
    %18 = vector.broadcast %cst : f32 to vector<64x128xf32>
    %19 = arith.cmpf oge, %17, %18 : vector<64x128xf32>
    %20 = vector.broadcast %0 : f32 to vector<64x128xf32>
    %21 = arith.mulf %20, %17 : vector<64x128xf32>
    %22 = arith.select %19, %17, %21 : vector<64x128xi1>, vector<64x128xf32>
    %c0_11 = arith.constant 0 : index
    %c0_12 = arith.constant 0 : index
    %23 = vector.load %arg7[%c0_11, %c0_12] : memref<32x64xf32, #tpu.memory_space<vmem>>, vector<32x64xf32>
    %cst_13 = arith.constant dense<0.000000e+00> : vector<32x128xf32>
    %24 = tpu.matmul %23, %22, %cst_13 {dimension_numbers = #tpu.dot_dimension_numbers<[1], [0], [0], [1], [0, 0, 1, 1], [], []>, precision = #tpu.contract_precision<fp32>} : vector<32x64xf32>, vector<64x128xf32>, vector<32x128xf32> -> vector<32x128xf32>
    %c0_14 = arith.constant 0 : index
    %c0_15 = arith.constant 0 : index
    %25 = vector.load %arg8[%c0_14, %c0_15] : memref<32x1xf32, #tpu.memory_space<vmem>>, vector<32x1xf32>
    %26 = vector.broadcast %25 : vector<32x1xf32> to vector<32x128xf32>
    %27 = arith.addf %24, %26 : vector<32x128xf32>
    %cst_16 = arith.constant 0.000000e+00 : f32
    %28 = vector.broadcast %cst_16 : f32 to vector<32x128xf32>
    %29 = arith.cmpf oge, %27, %28 : vector<32x128xf32>
    %30 = vector.broadcast %1 : f32 to vector<32x128xf32>
    %31 = arith.mulf %30, %27 : vector<32x128xf32>
    %32 = arith.select %29, %27, %31 : vector<32x128xi1>, vector<32x128xf32>
    %c0_17 = arith.constant 0 : index
    %c0_18 = arith.constant 0 : index
    %33 = vector.load %arg9[%c0_17, %c0_18] : memref<8x32xf32, #tpu.memory_space<vmem>>, vector<8x32xf32>
    %cst_19 = arith.constant dense<0.000000e+00> : vector<8x128xf32>
    %34 = tpu.matmul %33, %32, %cst_19 {dimension_numbers = #tpu.dot_dimension_numbers<[1], [0], [0], [1], [0, 0, 1, 1], [], []>, precision = #tpu.contract_precision<fp32>} : vector<8x32xf32>, vector<32x128xf32>, vector<8x128xf32> -> vector<8x128xf32>
    %c0_20 = arith.constant 0 : index
    %c0_21 = arith.constant 0 : index
    %35 = vector.load %arg10[%c0_20, %c0_21] : memref<8x1xf32, #tpu.memory_space<vmem>>, vector<8x1xf32>
    %36 = vector.broadcast %35 : vector<8x1xf32> to vector<8x128xf32>
    %37 = arith.addf %34, %36 : vector<8x128xf32>
    %c0_22 = arith.constant 0 : index
    %c0_23 = arith.constant 0 : index
    %c0_24 = arith.constant 0 : index
    %38 = vector.load %arg11[%c0_22, %c0_23, %c0_24] : memref<1x8x128xf32, #tpu.memory_space<vmem>>, vector<1x8x128xf32>
    %39 = vector.shape_cast %38 : vector<1x8x128xf32> to vector<8x128xf32>
    %40 = vector.shape_cast %37 : vector<8x128xf32> to vector<1x8x128xf32>
    tpu.vector_store %arg11[%c0_22, %c0_23, %c0_24], %40 {strides = array<i32>} : memref<1x8x128xf32, #tpu.memory_space<vmem>>, vector<1x8x128xf32>,
    return
  }
  func.func @transform_0(%arg0: i32, %arg1: i32) -> (i32, i32) {
    %c0_i32 = arith.constant 0 : i32
    %c0_i32_0 = arith.constant 0 : i32
    %c0_i32_1 = arith.constant 0 : i32
    return %c0_i32, %c0_i32_0 : i32, i32
  }
  func.func @transform_1(%arg0: i32, %arg1: i32) -> (i32, i32) {
    %c0_i32 = arith.constant 0 : i32
    %c0_i32_0 = arith.constant 0 : i32
    %c0_i32_1 = arith.constant 0 : i32
    return %c0_i32, %c0_i32_0 : i32, i32
  }
  func.func @transform_2(%arg0: i32, %arg1: i32) -> (i32, i32, i32) {
    %c0_i32 = arith.constant 0 : i32
    %c0_i32_0 = arith.constant 0 : i32
    return %arg0, %c0_i32, %arg1 : i32, i32, i32
  }
  func.func @transform_3(%arg0: i32, %arg1: i32) -> (i32, i32) {
    %c0_i32 = arith.constant 0 : i32
    %c0_i32_0 = arith.constant 0 : i32
    %c0_i32_1 = arith.constant 0 : i32
    return %c0_i32, %c0_i32_0 : i32, i32
  }
  func.func @transform_4(%arg0: i32, %arg1: i32) -> (i32, i32) {
    %c0_i32 = arith.constant 0 : i32
    %c0_i32_0 = arith.constant 0 : i32
    %c0_i32_1 = arith.constant 0 : i32
    return %c0_i32, %c0_i32_0 : i32, i32
  }
  func.func @transform_5(%arg0: i32, %arg1: i32) -> (i32, i32) {
    %c0_i32 = arith.constant 0 : i32
    %c0_i32_0 = arith.constant 0 : i32
    %c0_i32_1 = arith.constant 0 : i32
    return %c0_i32, %c0_i32_0 : i32, i32
  }
  func.func @transform_6(%arg0: i32, %arg1: i32) -> (i32, i32) {
    %c0_i32 = arith.constant 0 : i32
    %c0_i32_0 = arith.constant 0 : i32
    %c0_i32_1 = arith.constant 0 : i32
    return %c0_i32, %c0_i32_0 : i32, i32
  }
  func.func @transform_7(%arg0: i32, %arg1: i32) -> (i32, i32) {
    %c0_i32 = arith.constant 0 : i32
    %c0_i32_0 = arith.constant 0 : i32
    %c0_i32_1 = arith.constant 0 : i32
    return %c0_i32, %c0_i32_0 : i32, i32
  }
  func.func @transform_8(%arg0: i32, %arg1: i32) -> (i32, i32) {
    %c0_i32 = arith.constant 0 : i32
    %c0_i32_0 = arith.constant 0 : i32
    %c0_i32_1 = arith.constant 0 : i32
    return %c0_i32, %c0_i32_0 : i32, i32
  }
  func.func @transform_9(%arg0: i32, %arg1: i32) -> (i32, i32, i32) {
    %c0_i32 = arith.constant 0 : i32
    %c0_i32_0 = arith.constant 0 : i32
    return %arg0, %c0_i32, %arg1 : i32, i32, i32
  }
}

</mosaic_0001>

<bundles_post_ra>
// kernel: context_mlp_forward.1
= control target key start
LH: loop header
LB: loop body
LE: loop exit
PB: predicated region body
PF: predicated region fallthrough
CT: control target
= control target key end

     0   :  { %s2449_s13 = smov 0   ;;  %s2451_s14 = smov 0   ;;  %s2795_s0 = inlined_call_operand.<no memory space> [shape: f32[1,1], index: 0, kind: input, shape index: {}]   ;;  %s2796_s1 = inlined_call_operand.<no memory space> [shape: f32[1,1], index: 1, kind: input, shape index: {}]   ;;  %s2797_s2 = inlined_call_operand.vmem [shape: f32[2,4,128], index: 2, kind: input, shape index: {}]   ;;  %s2798_s3 = inlined_call_operand.vmem [shape: f32[64,2], index: 3, kind: input, shape index: {}]   ;;  %s2799_s4 = inlined_call_operand.vmem [shape: f32[64,1], index: 4, kind: input, shape index: {}]   ;;  %s2800_s5 = inlined_call_operand.vmem [shape: f32[32,64], index: 5, kind: input, shape index: {}]   ;;  %s2801_s6 = inlined_call_operand.vmem [shape: f32[32,1], index: 6, kind: input, shape index: {}]   ;;  %s2802_s7 = inlined_call_operand.vmem [shape: f32[8,32], index: 7, kind: input, shape index: {}]   ;;  %s2803_s8 = inlined_call_operand.vmem [shape: f32[8,1], index: 8, kind: input, shape index: {}]   ;;  %s2804_s9 = inlined_call_operand.vmem [shape: f32[2,8,128], index: 9, kind: output, shape index: {}]  }
   0x1   :  { %14 = sst [smem:[#allocation2]] %s2795_s0  ;;  %s2453_s15 = smov 0  }
   0x2   :  { %15 = sst [smem:[#allocation3]] %s2796_s1 }
   0x3 LB: > { %s33_s0 = sadd.s32 1, %s2382_s14  ;;  %p1852_p0 = scmp.ge.s32.totalorder %s2386_s15, 1  ;;  %s2386_s15 = sphi %s2453_s15, %s21_s15   ;;  %s2382_s14 = sphi %s2451_s14, %s2806_s14   ;;  %s2378_s13 = sphi %s2449_s13, %s2805_s13  }
   0x4   : > { %p35_p1 = scmp.ge.s32.totalorder %s33_s0, 2  ;;  %p307_p2 = scmp.lt.s32.totalorder %s2386_s15, 3 }
   0x6   : > { %s2808_s0 = smov (%p35_p1, %s33_s0), 0  ;;  %p308_p3 = pnand %p1852_p0, %p307_p2 }
   0x7   : > { %v372_v0 = vld [vmem:[%s2798_s3] sm:$0xff] (!%p308_p3)  ;;  %v2388_v2 = vmov (!%p308_p3), 0   ;;  %v373_v3 = vld [vmem:[%s2798_s3 + $0x8] sm:$0xff] (!%p308_p3)  ;;  %v375_v5 = vld [vmem:[%s2798_s3 + $0x18] sm:$0xff] (!%p308_p3)  ;;  %v2389_v6 = vmov (!%p308_p3), 1   ;;  %vm585_vm0 = vcmask (!%p308_p3), 523264   ;;  %v420_v25 = vlaneseq (!%p308_p3) }
   0x8   : > { %311 = sbr.rel (%p308_p3) target bundleno = 749 (0x2ed), region = 56  ;;  %v364_v1 = vld [vmem:[%s2799_s4] sm:$0xff] (!%p308_p3)  ;;  %2353 = vset.pattern.permute.xlu1 (!%p308_p3), %v2388_v2  ;;  %2352 = vset.pattern.permute.xlu0 (!%p308_p3), %v2388_v2  ;;  %v365_v4 = vld [vmem:[%s2799_s4 + $0x8] sm:$0xff] (!%p308_p3)  ;;  %v374_v8 = vld [vmem:[%s2798_s3 + $0x10] sm:$0xff] (!%p308_p3)  ;;  %p347_p4 = scmp.lt.s32.totalorder (!%p308_p3), %s2378_s13, 1  ;;  %vm2391_vm9 = vmmov (!%p308_p3), 0  }
   0x9   : > { %382 = vperm.xlu0 (!%p308_p3), %2352, %v372_v0   ;;  %434 = vperm.xlu1 (!%p308_p3), %2353, %v364_v1   ;;  %v377_v7 = vld [vmem:[%s2798_s3 + $0x28] sm:$0xff] (!%p308_p3)  ;;  %v379_v9 = vld [vmem:[%s2798_s3 + $0x38] sm:$0xff] (!%p308_p3)  ;;  %v366_v10 = vld [vmem:[%s2799_s4 + $0x10] sm:$0xff] (!%p308_p3)  ;;  %v421_v26 = vshrl.u32 (!%p308_p3), %v420_v25, 7  ;;  %s361_s23 = sld [smem:[#allocation2]] (!%p308_p3)  ;;  %vm1284_vm10 = vcmask (!%p308_p3), 261120  }
   0xa   : > { %v367_v11 = vld [vmem:[%s2799_s4 + $0x18] sm:$0xff] (!%p308_p3)  ;;  %v376_v12 = vld [vmem:[%s2798_s3 + $0x20] sm:$0xff] (!%p308_p3)  ;;  %v378_v13 = vld [vmem:[%s2798_s3 + $0x30] sm:$0xff] (!%p308_p3)  ;;  %s362_s11 = sld [smem:[#allocation3]] (!%p308_p3) }
   0xb   : > { %v368_v14 = vld [vmem:[%s2799_s4 + $0x20] sm:$0xff] (!%p308_p3)  ;;  %v369_v15 = vld [vmem:[%s2799_s4 + $0x28] sm:$0xff] (!%p308_p3)  ;;  %v370_v16 = vld [vmem:[%s2799_s4 + $0x30] sm:$0xff] (!%p308_p3)  ;;  %v422_v29 = vsub.s32 (!%p308_p3), 0, %v421_v26  ;;  %v514_v32 = vsub.s32 (!%p308_p3), 1, %v421_v26 }
   0xc   : > { %v371_v17 = vld [vmem:[%s2799_s4 + $0x38] sm:$0xff] (!%p308_p3)  ;;  %v557_v18 = vld [vmem:[%s2800_s5] sm:$0xff] (!%p308_p3)  ;;  %v562_v34 = vld [vmem:[%s2801_s6 + $0x8] sm:$0xff] (!%p308_p3) }
   0xd   : > { %387 = vperm.xlu0 (!%p308_p3), %2352, %v373_v3   ;;  %439 = vperm.xlu1 (!%p308_p3), %2353, %v365_v4   ;;  %v587_v19 = vsel (!%p308_p3), %vm585_vm0, %v557_v18, 0  ;;  %v561_v35 = vld [vmem:[%s2801_s6] sm:$0xff] (!%p308_p3)  ;;  %v563_v36 = vld [vmem:[%s2801_s6 + $0x10] sm:$0xff] (!%p308_p3)  ;;  %v564_v43 = vld [vmem:[%s2801_s6 + $0x18] sm:$0xff] (!%p308_p3) }
   0xe   : > { %v2521_v20 = vand.u32 (!%p308_p3), 4294901760, %v587_v19  ;;  %v1278_v37 = vld [vmem:[%s2803_s8] sm:$0xff] (!%p308_p3) }
   0xf   : > { %s2810_s13 = smov (!%p347_p4, %s2378_s13), 1  ;;  %v2564_v50 = vstv %s361_s23 }
  0x10   : > { %v2524_v21 = vsub.f32 %v587_v19, %v2521_v20  ;;  %s1853_s30 = sshll.u32 %s2810_s13, 2  ;;  %s1854_s16 = sshll.u32 %s2810_s13, 3 }
  0x11   : > { %397 = vperm.xlu0 %2352, %v375_v5   ;;  %2354 = vset.pattern.permute.xlu1 %v2389_v6  ;;  %s353_s12 = scalar_lea.vmem %s2797_s2, %s1853_s30  ;;  %s360_s19 = scalar_lea.vmem %s2804_s9, %s1854_s16 }
  0x12   : > { %485 = vperm.xlu1 %2354, %v373_v3   ;;  %v673_v22 = vand.u32 4294901760, %v2524_v21  ;;  %2019 = vmatprep.mubr.f32.mxu0 %v2524_v21  ;;  %v363_v33 = vld [vmem:[%s353_s12] sm:$0xf] }
  0x13   : > { %v2551_v38 = vrot.slane %v363_v33, %v422_v29  ;;  %v2553_v40 = vrot.slane %v363_v33, %v514_v32 }
  0x14   : > { %v674_v23 = vsub.f32 %v2524_v21, %v673_v22 }
  0x15   : > { %407 = vperm.xlu0 %2352, %v377_v7  }
  0x16   : > { %2355 = vset.pattern.permute.xlu1 %v2388_v2  ;;  %v675_v24 = vand.u32 4294901760, %v674_v23 }
  0x17   : > { %392 = vperm.xlu1 %2355, %v374_v8  }
  0x18   : > { %1975 = vmatprep.mubr.f32.mxu1 %v675_v24 }
  0x19   : > { %417 = vperm.xlu0 %2352, %v379_v9  }
  0x1b   : > { %444 = vperm.xlu1 %2355, %v366_v10  }
  0x1d   : > { %2360 = vset.pattern.permute.xlu0 %v2389_v6 }
  0x1e   : > { %481 = vperm.xlu0 %2360, %v372_v0  }
  0x1f   : > { %449 = vperm.xlu1 %2355, %v367_v11  }
  0x22   : > { %489 = vperm.xlu0 %2360, %v374_v8  }
  0x23   : > { %2356 = vset.pattern.permute.xlu1 %v2389_v6 }
  0x24   : > { %493 = vperm.xlu1 %2356, %v375_v5  }
  0x26   : > { %497 = vperm.xlu0 %2360, %v376_v12  }
  0x28   : > { %2357 = vset.pattern.permute.xlu1 %v2388_v2 }
  0x29   : > { %402 = vperm.xlu1 %2357, %v376_v12  }
  0x2a   : > { %505 = vperm.xlu0 %2360, %v378_v13  }
  0x2d   : > { %454 = vperm.xlu1 %2357, %v368_v14  }
  0x2e   : > { %2363 = vset.pattern.permute.xlu0 %v2388_v2 }
  0x2f   : > { %572 = vperm.xlu0 %2363, %v562_v34  }
  0x31   : > { %459 = vperm.xlu1 %2357, %v369_v15  }
  0x33   : > { %1281 = vperm.xlu0 %2363, %v1278_v37  }
  0x35   : > { %2358 = vset.pattern.permute.xlu1 %v2389_v6 }
  0x36   : > { %501 = vperm.xlu1 %2358, %v377_v7  }
  0x3a   : > { %2359 = vset.pattern.permute.xlu1 %v2388_v2 }
  0x3b   : > { %412 = vperm.xlu1 %2359, %v378_v13  }
  0x3f   : > { %464 = vperm.xlu1 %2359, %v370_v16  }
  0x43   : > { %469 = vperm.xlu1 %2359, %v371_v17  }
  0x47   : > { %2361 = vset.pattern.permute.xlu1 %v2389_v6 }
  0x48   : > { %509 = vperm.xlu1 %2361, %v379_v9  }
  0x4c   : > { %2362 = vset.pattern.permute.xlu1 %v2388_v2 }
  0x4d   : > { %567 = vperm.xlu1 %2362, %v561_v35  }
  0x51   : > { %577 = vperm.xlu1 %2362, %v563_v36  }
  0x55   : > { %582 = vperm.xlu1 %2362, %v564_v43  }
  0x88   : > { %v383_v27 = vpop.permute.xlu0 %382  ;;  %v435_v28 = vpop.permute.xlu1 %434 }
  0x89   : > { %v424_v51 = vmul.f32 %v2551_v38, %v383_v27 }
  0x8b   : > { %v472_v55 = vadd.f32 %v435_v28, %v424_v51 }
  0x8c   : > { %v388_v30 = vpop.permute.xlu0 %387  ;;  %v440_v31 = vpop.permute.xlu1 %439 }
  0x8d   : > { %v425_v42 = vmul.f32 %v2551_v38, %v388_v30 }
  0x8f   : > { %v473_v46 = vadd.f32 %v440_v31, %v425_v42 }
  0x90   : > { %v398_v39 = vpop.permute.xlu0 %397 }
  0x91   : > { %v486_v41 = vpop.permute.xlu1 %485  ;;  %v427_v58 = vmul.f32 %v2551_v38, %v398_v39 }
  0x92   : > { %v517_v44 = vmul.f32 %v2553_v40, %v486_v41 }
  0x94   : > { %v2560_v45 = vpop.permute.xlu0 %407  ;;  %v525_v48 = vadd.f32 %v517_v44, %v473_v46 }
  0x95   : > { %v429_v35 = vmul.f32 %v2551_v38, %v2560_v45 }
  0x96   : > { %v393_v47 = vpop.permute.xlu1 %392  ;;  %v542_v53 = vmul.f32 %v2564_v50, %v525_v48  ;;  %vm533_vm1 = vcmp.ge.f32.partialorder %v525_v48, 0.0 }
  0x97   : > { %v426_v60 = vmul.f32 %v2551_v38, %v393_v47 }
  0x98   : > { %v2562_v49 = vpop.permute.xlu0 %417  ;;  %v550_v59 = vsel %vm533_vm1, %v525_v48, %v542_v53  ;;  %v558_v48 = vld [vmem:[%s2800_s5 + $0x8] sm:$0xff] }
  0x99   : > { %v602_v2 = vand.u32 4294901760, %v550_v59 }
  0x9a   : > { %v445_v52 = vpop.permute.xlu1 %444 }
  0x9b   : > { %v474_v63 = vadd.f32 %v445_v52, %v426_v60  ;;  %v2579_v13 = vsub.f32 %v550_v59, %v602_v2  ;;  %v559_v60 = vld [vmem:[%s2800_s5 + $0x10] sm:$0xff] }
  0x9d   : > { %v482_v54 = vpop.permute.xlu0 %481 }
  0x9e   : > { %v516_v56 = vmul.f32 %v2553_v40, %v482_v54  ;;  %v450_v57 = vpop.permute.xlu1 %449 }
  0x9f   : > { %v475_v5 = vadd.f32 %v450_v57, %v427_v58 }
  0xa0   : > { %v524_v61 = vadd.f32 %v516_v56, %v472_v55  ;;  %v590_v55 = vsel %vm585_vm0, %v558_v48, 0 }
  0xa1   : > { %v490_v62 = vpop.permute.xlu0 %489 }
  0xa2   : > { %vm532_vm2 = vcmp.ge.f32.partialorder %v524_v61, 0.0  ;;  %v541_v0 = vmul.f32 %v2564_v50, %v524_v61  ;;  %v518_v1 = vmul.f32 %v2553_v40, %v490_v62 }
  0xa3   : > { %v494_v3 = vpop.permute.xlu1 %493 }
  0xa4   : > { %v549_v4 = vsel %vm532_vm2, %v524_v61, %v541_v0  ;;  %v526_v6 = vadd.f32 %v518_v1, %v474_v63  ;;  %v519_v7 = vmul.f32 %v2553_v40, %v494_v3  ;;  %v560_v63 = vld [vmem:[%s2800_s5 + $0x18] sm:$0xff]  ;;  %v593_v3 = vsel %vm585_vm0, %v559_v60, 0 }
  0xa5   : > { %v599_v8 = vand.u32 4294901760, %v549_v4  ;;  %v498_v19 = vpop.permute.xlu0 %497 }
  0xa6   : > { %vm534_vm3 = vcmp.ge.f32.partialorder %v526_v6, 0.0  ;;  %v543_v9 = vmul.f32 %v2564_v50, %v526_v6  ;;  %v527_v10 = vadd.f32 %v519_v7, %v475_v5  ;;  %v520_v26 = vmul.f32 %v2553_v40, %v498_v19 }
  0xa7   : > { %v2575_v11 = vpack.c.bf16 %v602_v2, %v599_v8  ;;  %v2577_v12 = vsub.f32 %v549_v4, %v599_v8  ;;  %v2625_v2 = vand.u32 4294901760, %v590_v55  ;;  %v596_v4 = vsel %vm585_vm0, %v560_v63, 0 }
  0xa8   : > { %v551_v14 = vsel %vm534_vm3, %v526_v6, %v543_v9  ;;  %vm535_vm4 = vcmp.ge.f32.partialorder %v527_v10, 0.0  ;;  %v544_v15 = vmul.f32 %v2564_v50, %v527_v10  ;;  %v403_v16 = vpop.permute.xlu1 %402  ;;  %v2629_v5 = vand.u32 4294901760, %v593_v3 }
  0xa9   : > { %v605_v17 = vand.u32 4294901760, %v551_v14  ;;  %2158 = vmatprep.subr.bf16.mxu1 %v2575_v11  ;;  %v2189_v18 = vpack.c.bf16 %v2579_v13, %v2577_v12  ;;  %v428_v25 = vmul.f32 %v2551_v38, %v403_v16  ;;  %v506_v53 = vpop.permute.xlu0 %505  ;;  %v431_v6 = vmul.f32 %v2551_v38, %v2562_v49 }
  0xaa   : > { %v552_v23 = vsel %vm535_vm4, %v527_v10, %v544_v15  ;;  %2160 = vmatpush3.bf16.msra.mxu1 %v2575_v11  ;;  %v522_v61 = vmul.f32 %v2553_v40, %v506_v53  ;;  %v714_v8 = vand.u32 4294901760, %v2577_v12  ;;  %v2636_v9 = vsub.f32 %v590_v55, %v2625_v2 }
  0xab   : > { %v608_v24 = vand.u32 4294901760, %v552_v23  ;;  %2190 = vmatprep.subr.bf16.mxu0 %v2189_v18  ;;  %v2588_v28 = vsub.f32 %v551_v14, %v605_v17  ;;  %v2638_v14 = vand.u32 4294901760, %v596_v4 }
  0xac   : > { %v455_v27 = vpop.permute.xlu1 %454  ;;  %2192 = vmatpush3.bf16.msra.mxu0 %v2189_v18  ;;  %v2643_v18 = vsub.f32 %v593_v3, %v2629_v5  ;;  %v715_v19 = vsub.f32 %v2577_v12, %v714_v8 }
  0xad   : > { %v2590_v29 = vpack.c.bf16 %v608_v24, %v605_v17  ;;  %v2592_v30 = vsub.f32 %v552_v23, %v608_v24  ;;  %v476_v31 = vadd.f32 %v455_v27, %v428_v25  ;;  %v721_v17 = vand.u32 4294901760, %v2579_v13 }
  0xae   : > { %v683_v23 = vand.u32 4294901760, %v2636_v9  ;;  %v2651_v25 = vsub.f32 %v596_v4, %v2638_v14 }
  0xaf   : > { %2162 = vmatprep.subr.bf16.mxu1 %v2590_v29  ;;  %v2193_v32 = vpack.c.bf16 %v2592_v30, %v2588_v28  ;;  %v528_v33 = vadd.f32 %v520_v26, %v476_v31  ;;  %v735_v24 = vand.u32 4294901760, %v2592_v30  ;;  %v722_v27 = vsub.f32 %v2579_v13, %v721_v17 }
  0xb0   : > { %v460_v34 = vpop.permute.xlu1 %459  ;;  %2164 = vmatpush3.bf16.msra.mxu1 %v2590_v29  ;;  %v728_v31 = vand.u32 4294901760, %v2588_v28 }
  0xb1   : > { %2194 = vmatprep.subr.bf16.mxu0 %v2193_v32  ;;  %v545_v36 = vmul.f32 %v2564_v50, %v528_v33  ;;  %vm536_vm5 = vcmp.ge.f32.partialorder %v528_v33, 0.0  ;;  %v477_v39 = vadd.f32 %v460_v34, %v429_v35  ;;  %v716_v34 = vand.u32 4294901760, %v715_v19 }
  0xb2   : > { %2196 = vmatpush3.bf16.msra.mxu0 %v2193_v32  ;;  %v684_v35 = vsub.f32 %v2636_v9, %v683_v23  ;;  %v2225_v21 = vpack.c.bf16 %v735_v24, %v728_v31  ;;  %v1268_v19 = vstv %s362_s11 }
  0xb3   : > { %v553_v42 = vsel %vm536_vm5, %v528_v33, %v545_v36  ;;  %v703_v36 = vand.u32 4294901760, %v2651_v25 }
  0xb4   : > { %v611_v47 = vand.u32 4294901760, %v553_v42 }
  0xb5   : > { %v502_v37 = vpop.permute.xlu1 %501 }
  0xb6   : > { %v521_v41 = vmul.f32 %v2553_v40, %v502_v37  ;;  %v2608_v56 = vsub.f32 %v553_v42, %v611_v47  ;;  %v729_v42 = vsub.f32 %v2588_v28, %v728_v31 }
  0xb8   : > { %v529_v43 = vadd.f32 %v521_v41, %v477_v39  ;;  %v723_v41 = vand.u32 4294901760, %v722_v27  ;;  %v742_v48 = vand.u32 4294901760, %v2608_v56 }
  0xba   : > { %vm537_vm6 = vcmp.ge.f32.partialorder %v529_v43, 0.0  ;;  %v546_v44 = vmul.f32 %v2564_v50, %v529_v43  ;;  %v413_v46 = vpop.permute.xlu1 %412 }
  0xbb   : > { %v430_v52 = vmul.f32 %v2551_v38, %v413_v46 }
  0xbc   : > { %v554_v51 = vsel %vm537_vm6, %v529_v43, %v546_v44 }
  0xbd   : > { %v614_v45 = vand.u32 4294901760, %v554_v51 }
  0xbe   : > { %v465_v54 = vpop.permute.xlu1 %464 }
  0xbf   : > { %v2610_v57 = vpack.c.bf16 %v614_v45, %v611_v47  ;;  %v2612_v58 = vsub.f32 %v554_v51, %v614_v45  ;;  %v478_v59 = vadd.f32 %v465_v54, %v430_v52  ;;  %v2173_v51 = vpack.c.bf16 %v723_v41, %v716_v34 }
  0xc0   : > { %v685_v45 = vand.u32 4294901760, %v684_v35  ;;  %v704_v52 = vsub.f32 %v2651_v25, %v703_v36 }
  0xc1   : > { %2166 = vmatprep.subr.bf16.mxu1 %v2610_v57  ;;  %v2197_v62 = vpack.c.bf16 %v2612_v58, %v2608_v56  ;;  %v530_v0 = vadd.f32 %v522_v61, %v478_v59  ;;  %v749_v39 = vand.u32 4294901760, %v2612_v58  ;;  %v730_v61 = vand.u32 4294901760, %v729_v42 }
  0xc2   : > { %v470_v1 = vpop.permute.xlu1 %469  ;;  %2168 = vmatpush3.bf16.msra.mxu1 %v2610_v57  ;;  %v705_v4 = vand.u32 4294901760, %v704_v52 }
  0xc3   : > { %2198 = vmatprep.subr.bf16.mxu0 %v2197_v62  ;;  %v547_v7 = vmul.f32 %v2564_v50, %v530_v0  ;;  %vm538_vm7 = vcmp.ge.f32.partialorder %v530_v0, 0.0  ;;  %v479_v15 = vadd.f32 %v470_v1, %v431_v6  ;;  %v750_v55 = vsub.f32 %v2612_v58, %v749_v39  ;;  %v1277_v58 = vld [vmem:[%s2802_s7] sm:$0xff] }
  0xc4   : > { %2200 = vmatpush3.bf16.msra.mxu0 %v2197_v62  ;;  %v743_v62 = vsub.f32 %v2608_v56, %v742_v48 }
  0xc5   : > { %v555_v38 = vsel %vm538_vm7, %v530_v0, %v547_v7  ;;  %v751_v1 = vand.u32 4294901760, %v750_v55 }
  0xc6   : > { %v617_v32 = vand.u32 4294901760, %v555_v38  ;;  %v744_v6 = vand.u32 4294901760, %v743_v62 }
  0xc7   : > { %v510_v10 = vpop.permute.xlu1 %509 }
  0xc8   : > { %v523_v16 = vmul.f32 %v2553_v40, %v510_v10  ;;  %v693_v40 = vand.u32 4294901760, %v2643_v18  ;;  %v2673_v44 = vsub.f32 %v555_v38, %v617_v32  ;;  %v2181_v56 = vpack.c.bf16 %v751_v1, %v744_v6 }
  0xc9   : > { %v2221_v38 = vpack.c.bf16 %v721_v17, %v714_v8  ;;  %v573_v8 = vpop.permute.xlu0 %572 }
  0xca   : > { %v531_v49 = vadd.f32 %v523_v16, %v479_v15  ;;  %v694_v43 = vsub.f32 %v2643_v18, %v693_v40  ;;  %v756_v63 = vand.u32 4294901760, %v2673_v44 }
  0xcc   : > { %vm539_vm8 = vcmp.ge.f32.partialorder %v531_v49, 0.0  ;;  %v548_v26 = vmul.f32 %v2564_v50, %v531_v49  ;;  %v736_v50 = vsub.f32 %v2592_v30, %v735_v24  ;;  %v695_v60 = vand.u32 4294901760, %v694_v43 }
  0xcd   : > { %v757_v7 = vsub.f32 %v2673_v44, %v756_v63 }
  0xce   : > { %v556_v33 = vsel %vm539_vm8, %v531_v49, %v548_v26  ;;  %v737_v54 = vand.u32 4294901760, %v736_v50 }
  0xcf   : > { %v620_v37 = vand.u32 4294901760, %v556_v33  ;;  %v758_v15 = vand.u32 4294901760, %v757_v7 }
  0xd0   : > { %v2177_v0 = vpack.c.bf16 %v737_v54, %v730_v61 }
  0xd1   : > { %v2675_v46 = vpack.c.bf16 %v620_v37, %v617_v32  ;;  %v2677_v47 = vsub.f32 %v556_v33, %v620_v37 }
  0xd3   : > { %2170 = vmatprep.subr.bf16.mxu1 %v2675_v46  ;;  %v2201_v53 = vpack.c.bf16 %v2677_v47, %v2673_v44  ;;  %v763_v59 = vand.u32 4294901760, %v2677_v47 }
  0xd4   : > { %2172 = vmatpush3.bf16.msra.mxu1 %v2675_v46 }
  0xd5   : > { %2174 = vmatprep.subr.bf16.mxu1 %v2173_v51  ;;  %2202 = vmatprep.subr.bf16.mxu0 %v2201_v53  ;;  %v764_v3 = vsub.f32 %v2677_v47, %v763_v59  ;;  %v2233_v12 = vpack.c.bf16 %v763_v59, %v756_v63 }
  0xd6   : > { %2204 = vmatpush3.bf16.msra.mxu0 %v2201_v53 }
  0xd7   : > { %2206 = vmatprep.subr.bf16.mxu0 %v2575_v11  ;;  %1976 = vmatmul.mubr.f32.vlgmr.msra.gmra.mrb[0].mxu1 %v685_v45  ;;  %v765_v10 = vand.u32 4294901760, %v764_v3 }
  0xd8   : > { %2176 = vmatpush3.bf16.msra.mxu1 %v2173_v51  ;;  %1978 = vmatprep.mubr.f32.mxu1 %v695_v60 }
  0xd9   : > { %2178 = vmatprep.subr.bf16.mxu1 %v2177_v0  ;;  %2020 = vmatmul.mubr.f32.vlgmr.msra.gmra.mrb[0].mxu0 %v2636_v9  ;;  %v2185_v16 = vpack.c.bf16 %v765_v10, %v758_v15 }
  0xda   : > { %2208 = vmatpush3.bf16.msra.mxu0 %v2575_v11  ;;  %2022 = vmatprep.mubr.f32.mxu0 %v2643_v18 }
  0xdb   : > { %2210 = vmatprep.subr.bf16.mxu0 %v2590_v29  ;;  %1979 = vmatmul.mubr.f32.gmra.mrb[2].mxu1 %v705_v4 }
  0xdc   : > { %2180 = vmatpush3.bf16.msra.mxu1 %v2177_v0  ;;  %1997 = vmatprep.mubr.f32.mxu1 %v2521_v20 }
  0xdd   : > { %2182 = vmatprep.subr.bf16.mxu1 %v2181_v56  ;;  %2023 = vmatmul.mubr.f32.gmra.mrb[2].mxu0 %v2651_v25 }
  0xde   : > { %2212 = vmatpush3.bf16.msra.mxu0 %v2590_v29  ;;  %2041 = vmatprep.mubr.f32.mxu0 %v673_v22  ;;  %v2229_v22 = vpack.c.bf16 %v749_v39, %v742_v48 }
  0xdf   : > { %2214 = vmatprep.subr.bf16.mxu0 %v2610_v57 }
  0xe0   : > { %2184 = vmatpush3.bf16.msra.mxu1 %v2181_v56 }
  0xe1   : > { %2186 = vmatprep.subr.bf16.mxu1 %v2185_v16 }
  0xe2   : > { %2216 = vmatpush3.bf16.msra.mxu0 %v2610_v57 }
  0xe3   : > { %2218 = vmatprep.subr.bf16.mxu0 %v2675_v46 }
  0xe4   : > { %2188 = vmatpush3.bf16.msra.mxu1 %v2185_v16 }
  0xe6   : > { %2220 = vmatpush3.bf16.msra.mxu0 %v2675_v46 }
  0xe7   : > { %2222 = vmatprep.subr.bf16.mxu0 %v2221_v38  ;;  %1998 = vmatmul.mubr.f32.vlgmr.msra.gmra.mrb[0].mxu1 %v2625_v2 }
  0xe8   : > { %2000 = vmatprep.mubr.f32.mxu1 %v2629_v5 }
  0xe9   : > { %2042 = vmatmul.mubr.f32.vlgmr.msra.gmra.mrb[0].mxu0 %v683_v23 }
  0xea   : > { %2224 = vmatpush3.bf16.msra.mxu0 %v2221_v38  ;;  %2044 = vmatprep.mubr.f32.mxu0 %v693_v40 }
  0xeb   : > { %2226 = vmatprep.subr.bf16.mxu0 %v2225_v21  ;;  %2001 = vmatmul.mubr.f32.gmra.mrb[2].mxu1 %v2638_v14 }
  0xed   : > { %2045 = vmatmul.mubr.f32.gmra.mrb[2].mxu0 %v703_v36 }
  0xee   : > { %2228 = vmatpush3.bf16.msra.mxu0 %v2225_v21  ;;  %2063 = vmatprep.mubr.f32.mxu0 %v2521_v20 }
  0xef   : > { %2230 = vmatprep.subr.bf16.mxu0 %v2229_v22 }
  0xf2   : > { %2232 = vmatpush3.bf16.msra.mxu0 %v2229_v22 }
  0xf3   : > { %2234 = vmatprep.subr.bf16.mxu0 %v2233_v12 }
  0xf6   : > { %2236 = vmatpush3.bf16.msra.mxu0 %v2233_v12 }
  0xf7   : > { %2238 = vmatprep.subr.bf16.mxu0 %v2575_v11 }
  0xf9   : > { %2064 = vmatmul.mubr.f32.vlgmr.msra.gmra.mrb[0].mxu0 %v2625_v2 }
  0xfa   : > { %2240 = vmatpush3.bf16.msra.mxu0 %v2575_v11  ;;  %2066 = vmatprep.mubr.f32.mxu0 %v2629_v5  ;;  %v2390_v11 = vmov 0.0|0.0  }
  0xfb   : > { %2242 = vmatprep.subr.bf16.mxu0 %v2590_v29  ;;  %2259 = vmatprep.subr.bf16.mxu1 %v2390_v11 }
  0xfd   : > { %2067 = vmatmul.mubr.f32.gmra.mrb[2].mxu0 %v2638_v14 }
  0xfe   : > { %2244 = vmatpush3.bf16.msra.mxu0 %v2590_v29  ;;  %2085 = vmatprep.mubr.f32.mxu0 %v2521_v20  ;;  %v2392_v20 = vmov 0.0  }
  0xff   : > { %2246 = vmatprep.subr.bf16.mxu0 %v2610_v57  ;;  %2110 = vmatprep.mubr.msk.f32.mxu1 %vm2391_vm9, %v2392_v20 }
 0x102   : > { %2248 = vmatpush3.bf16.msra.mxu0 %v2610_v57  ;;  %v568_v57 = vpop.permute.xlu1 %567 }
 0x103   : > { %2250 = vmatprep.subr.bf16.mxu0 %v2675_v46 }
 0x106   : > { %2252 = vmatpush3.bf16.msra.mxu0 %v2675_v46 }
 0x107   : > { %2253 = vmatprep.subr.bf16.mxu0 %v2390_v11 }
 0x109   : > { %2086 = vmatmul.mubr.f32.vlgmr.msra.gmra.mrb[0].mxu0 %v2625_v2  ;;  %v578_v2 = vpop.permute.xlu1 %577 }
 0x10a   : > { %2088 = vmatprep.mubr.f32.mxu0 %v2629_v5  ;;  %v1286_v5 = vsel %vm1284_vm10, %v1277_v58, 0 }
 0x10b   : > { %v2753_v9 = vand.u32 4294901760, %v1286_v5 }
 0x10d   : > { %2089 = vmatmul.mubr.f32.gmra.mrb[2].mxu0 %v2638_v14  ;;  %v583_v18 = vpop.permute.xlu1 %582  ;;  %v2756_v40 = vsub.f32 %v1286_v5, %v2753_v9 }
 0x10e   : > { %2099 = vmatprep.mubr.msk.f32.mxu0 %vm2391_vm9, %v2392_v20 }
 0x10f   : > { %v1359_v41 = vand.u32 4294901760, %v2756_v40 }
 0x111   : > { %v1360_v54 = vsub.f32 %v2756_v40, %v1359_v41 }
 0x113   : > { %v1361_v6 = vand.u32 4294901760, %v1360_v54 }
 0x1ba   : > { %v1999_v13 = vpop.f32.mrb[0].mxu1 }
 0x1bb   : > { %v818_v28 = vpop.f32.mrb[1].mxu1  ;;  %v2289_v14 = vadd.f32 %v1999_v13, %v573_v8 }
 0x1bc   : > { %v2291_v17 = vadd.f32 %v818_v28, %v568_v57  ;;  %v1282_v57 = vpop.permute.xlu0 %1281 }
 0x1be   : > { %v2002_v29 = vpop.f32.mrb[2].mxu1 }
 0x1bf   : > { %v830_v30 = vpop.f32.mrb[3].mxu1  ;;  %v2293_v26 = vadd.f32 %v2002_v29, %v583_v18 }
 0x1c0   : > { %v2295_v31 = vadd.f32 %v830_v30, %v578_v2 }
 0x1dc   : > { %v2087_v49 = vpop.f32.mrb[0].mxu0 }
 0x1dd   : > { %v2290_v23 = vadd.f32 %v2289_v14, %v2087_v49  ;;  %v1242_v24 = vpop.f32.mrb[1].mxu0 }
 0x1de   : > { %v2292_v25 = vadd.f32 %v2291_v17, %v1242_v24 }
 0x1df   : > { %vm1265_vm11 = vcmp.ge.f32.partialorder %v2290_v23, 0.0  ;;  %v1270_v27 = vmul.f32 %v2290_v23, %v1268_v19 }
 0x1e0   : > { %vm1264_vm12 = vcmp.ge.f32.partialorder %v2292_v25, 0.0  ;;  %v1269_v32 = vmul.f32 %v2292_v25, %v1268_v19  ;;  %v2090_v33 = vpop.f32.mrb[2].mxu0 }
 0x1e1   : > { %v1274_v34 = vsel %vm1265_vm11, %v2290_v23, %v1270_v27  ;;  %v2294_v35 = vadd.f32 %v2293_v26, %v2090_v33  ;;  %v1254_v36 = vpop.f32.mrb[3].mxu0 }
 0x1e2   : > { %v1292_v37 = vand.u32 4294901760, %v1274_v34  ;;  %v1273_v50 = vsel %vm1264_vm12, %v2292_v25, %v1269_v32  ;;  %v2296_v39 = vadd.f32 %v2295_v31, %v1254_v36 }
 0x1e3   : > { %v1289_v42 = vand.u32 4294901760, %v1273_v50  ;;  %vm1267_vm13 = vcmp.ge.f32.partialorder %v2294_v35, 0.0  ;;  %v1272_v43 = vmul.f32 %v2294_v35, %v1268_v19 }
 0x1e4   : > { %v1376_v44 = vsub.f32 %v1274_v34, %v1292_v37  ;;  %vm1266_vm14 = vcmp.ge.f32.partialorder %v2296_v39, 0.0  ;;  %v1271_v46 = vmul.f32 %v2296_v39, %v1268_v19 }
 0x1e5   : > { %v1369_v47 = vsub.f32 %v1273_v50, %v1289_v42  ;;  %v1276_v48 = vsel %vm1267_vm13, %v2294_v35, %v1272_v43  ;;  %v2254_v51 = vpack.c.bf16 %v1292_v37, %v1289_v42 }
 0x1e6   : > { %v1377_v45 = vand.u32 4294901760, %v1376_v44  ;;  %v1298_v52 = vand.u32 4294901760, %v1276_v48  ;;  %v1275_v53 = vsel %vm1266_vm14, %v2296_v39, %v1271_v46 }
 0x1e7   : > { %v1370_v55 = vand.u32 4294901760, %v1369_v47  ;;  %v1295_v59 = vand.u32 4294901760, %v1275_v53  ;;  %2255 = vmatpush3.bf16.msra.mxu0 %v2254_v51  ;;  %v2266_v60 = vpack.c.bf16 %v1376_v44, %v1369_v47 }
 0x1e8   : > { %v1390_v61 = vsub.f32 %v1276_v48, %v1298_v52  ;;  %2256 = vmatprep.subr.bf16.mxu0 %v2390_v11  ;;  %v1378_v62 = vsub.f32 %v1376_v44, %v1377_v45 }
 0x1e9   : > { %v1383_v63 = vsub.f32 %v1275_v53, %v1295_v59  ;;  %v2257_v0 = vpack.c.bf16 %v1298_v52, %v1295_v59  ;;  %v1371_v1 = vsub.f32 %v1369_v47, %v1370_v55  ;;  %v2278_v3 = vpack.c.bf16 %v1377_v45, %v1370_v55 }
 0x1ea   : > { %v1391_v4 = vand.u32 4294901760, %v1390_v61  ;;  %v1379_v7 = vand.u32 4294901760, %v1378_v62 }
 0x1eb   : > { %v1384_v56 = vand.u32 4294901760, %v1383_v63  ;;  %2258 = vmatpush3.bf16.msra.mxu0 %v2257_v0  ;;  %v1372_v10 = vand.u32 4294901760, %v1371_v1  ;;  %v2269_v15 = vpack.c.bf16 %v1390_v61, %v1383_v63 }
 0x1ec   : > { %v1392_v16 = vsub.f32 %v1390_v61, %v1391_v4 }
 0x1ed   : > { %v2260_v38 = vpack.c.bf16 %v1379_v7, %v1372_v10  ;;  %v1385_v21 = vsub.f32 %v1383_v63, %v1384_v56  ;;  %v2281_v22 = vpack.c.bf16 %v1391_v4, %v1384_v56 }
 0x1ee   : > { %2100 = vmatmul.mubr.f32.vlgmr.msra.gmra.mrb[4].mxu0 %v1361_v6  ;;  %v1393_v12 = vand.u32 4294901760, %v1392_v16 }
 0x1ef   : > { %2261 = vmatpush3.bf16.msra.mxu1 %v2260_v38  ;;  %v1386_v13 = vand.u32 4294901760, %v1385_v21 }
 0x1f0   : > { %2262 = vmatprep.subr.bf16.mxu1 %v2390_v11 }
 0x1f1   : > { %v2263_v28 = vpack.c.bf16 %v1393_v12, %v1386_v13 }
 0x1f3   : > { %2264 = vmatpush3.bf16.msra.mxu1 %v2263_v28 }
 0x1f4   : > { %2265 = vmatprep.subr.bf16.mxu1 %v2390_v11 }
 0x1f6   : > { %2111 = vmatmul.mubr.f32.vlgmr.msra.gmra.mrb[4].mxu1 %v2753_v9 }
 0x1f7   : > { %2267 = vmatpush3.bf16.msra.mxu1 %v2266_v60  ;;  %2121 = vmatprep.mubr.msk.f32.mxu1 %vm2391_vm9, %v2392_v20 }
 0x1f8   : > { %2268 = vmatprep.subr.bf16.mxu1 %v2390_v11 }
 0x1fb   : > { %2270 = vmatpush3.bf16.msra.mxu1 %v2269_v15 }
 0x1fc   : > { %2271 = vmatprep.subr.bf16.mxu1 %v2390_v11 }
 0x1fe   : > { %2122 = vmatmul.mubr.f32.vlgmr.msra.gmra.mrb[4].mxu1 %v2756_v40 }
 0x1ff   : > { %2273 = vmatpush3.bf16.msra.mxu1 %v2254_v51  ;;  %2132 = vmatprep.mubr.msk.f32.mxu1 %vm2391_vm9, %v2392_v20 }
 0x200   : > { %2274 = vmatprep.subr.bf16.mxu1 %v2390_v11 }
 0x203   : > { %2276 = vmatpush3.bf16.msra.mxu1 %v2257_v0 }
 0x204   : > { %2277 = vmatprep.subr.bf16.mxu1 %v2390_v11 }
 0x206   : > { %2133 = vmatmul.mubr.f32.vlgmr.msra.gmra.mrb[4].mxu1 %v1359_v41 }
 0x207   : > { %2279 = vmatpush3.bf16.msra.mxu1 %v2278_v3  ;;  %2143 = vmatprep.mubr.msk.f32.mxu1 %vm2391_vm9, %v2392_v20 }
 0x208   : > { %2280 = vmatprep.subr.bf16.mxu1 %v2390_v11 }
 0x20b   : > { %2282 = vmatpush3.bf16.msra.mxu1 %v2281_v22 }
 0x20c   : > { %2283 = vmatprep.subr.bf16.mxu1 %v2390_v11 }
 0x20e   : > { %2144 = vmatmul.mubr.f32.vlgmr.msra.gmra.mrb[4].mxu1 %v2753_v9 }
 0x20f   : > { %2285 = vmatpush3.bf16.msra.mxu1 %v2254_v51  ;;  %2154 = vmatprep.mubr.msk.f32.mxu1 %vm2391_vm9, %v2392_v20 }
 0x210   : > { %2286 = vmatprep.subr.bf16.mxu1 %v2390_v11 }
 0x213   : > { %2288 = vmatpush3.bf16.msra.mxu1 %v2257_v0 }
 0x216   : > { %2155 = vmatmul.mubr.f32.vlgmr.msra.gmra.mrb[4].mxu1 %v2753_v9 }
 0x2c1   : > { %v1363_v29 = vpop.f32.mrb[4].mxu0 }
 0x2c2   : > { %v2101_v30 = vpop.f32.mrb[5].mxu0  ;;  %v1364_v58 = vadd.f32 %v1363_v29, %v1282_v57 }
 0x2e9   : > { %v1769_v2 = vpop.f32.mrb[4].mxu1 }
 0x2ea   : > { %v2298_v5 = vadd.f32 %v1769_v2, %v1364_v58  ;;  %v2156_v8 = vpop.f32.mrb[5].mxu1 }
 0x2ec   : > { %1773 = vst [vmem:[%s360_s19] sm:$0xff] %v2298_v5 }
 0x2ed PF: > { %s21_s15 = sadd.s32 1, %s2386_s15   ;;  %s2805_s13 = smov %s2382_s14 }
 0x2ee   : > { %p18_p5 = scmp.ge.s32.totalorder %s21_s15, 4   ;;  %s2806_s14 = smov %s2808_s0 }
 0x2f0   :  { %20 = sbr.rel (!%p18_p5) target bundleno = 3 (0x3), region = 86 }

</bundles_post_ra>
